<compile_context>
chip_gen: v7x
topology: tpu7x:2x2x1
jax: 0.10.0
libtpu: 0.0.40
codegen_flags: <defaults>
</compile_context>

<pallas_src>
import jax
import jax.numpy as jnp
from jax.experimental import pallas as pl
from jax.experimental.pallas import tpu as pltpu

_LANE = 128          # lane width (last dim)
_SUBLANE_BF16 = 16   # sublane packing for bf16 tiles (second-to-last dim)


def _round_up(x, m):
    return ((x + m - 1) // m) * m


def _pad2d(x, rows, cols):
    pr = rows - x.shape[0]
    pc = cols - x.shape[1]
    if pr == 0 and pc == 0:
        return x
    return jnp.pad(x, ((0, pr), (0, pc)))


def _fusion_kernel(
    nw_ref,                              # SMEM (3,) f32: softmaxed modality weights
    img_ref, aud_ref, txt_ref,           # (TB, Ip)/(TB, Ap)/(TB, Tp)  bf16
    wi_ref, bi_ref,                      # (Ip, Fp) bf16, (1, Fp) f32
    wa_ref, ba_ref,                      # (Ap, Fp) bf16, (1, Fp) f32
    wt_ref, bt_ref,                      # (Tp, Fp) bf16, (1, Fp) f32
    ca1_w_ref, ca1_b_ref,                # (Fp, Hp) bf16, (1, Hp) f32
    ca2_w_ref, ca2_b_ref,                # (Hp, Fp) bf16, (1, Fp) f32
    cls_w_ref, cls_b_ref,                # (Fp, Cp) bf16, (1, Cp) f32
    out_ref,                             # (TB, Cp) f32
):
    f32 = jnp.float32
    bf16 = jnp.bfloat16

    def dot(x, w_ref):
        return jnp.dot(x, w_ref[...], preferred_element_type=f32)

    # --- modality projections: Linear -> ReLU (Dropout = identity in eval) ---
    img_p = jnp.maximum(dot(img_ref[...], wi_ref) + bi_ref[...], 0.0)
    aud_p = jnp.maximum(dot(aud_ref[...], wa_ref) + ba_ref[...], 0.0)
    txt_p = jnp.maximum(dot(txt_ref[...], wt_ref) + bt_ref[...], 0.0)

    # --- softmax-weighted fusion (scalars precomputed, read once from SMEM) ---
    w0 = nw_ref[0]
    w1 = nw_ref[1]
    w2 = nw_ref[2]
    fused = w0 * img_p + w1 * aud_p + w2 * txt_p

    # --- channel attention: Linear -> ReLU -> Linear -> Sigmoid, then gate ---
    hidden = jnp.maximum(dot(fused.astype(bf16), ca1_w_ref) + ca1_b_ref[...], 0.0)
    attn = jax.nn.sigmoid(dot(hidden.astype(bf16), ca2_w_ref) + ca2_b_ref[...])
    gated = fused * attn

    # --- classifier: ReLU -> Linear (lane-dense padded classes, sliced outside) ---
    logits = dot(jnp.maximum(gated, 0.0).astype(bf16), cls_w_ref) + cls_b_ref[...]
    out_ref[...] = logits.astype(out_ref.dtype)


def multimodal_weighted_fusion(image_feat, audio_feat, text_feat, params,
                               *, block_b=None):
    """Fused forward pass. Returns (logits[B, C], norm_weights[3])."""
    B, image_dim = image_feat.shape
    audio_dim = audio_feat.shape[1]
    text_dim = text_feat.shape[1]
    fused_dim = params["wi"].shape[1]
    hidden_dim = params["ca1_w"].shape[1]
    num_classes = params["cls_w"].shape[1]

    # Lane-dense (multiple-of-128) padded dims: keeps all 6 matmuls on the
    # clean MXU path and makes the output stores unmasked.
    ip = _round_up(image_dim, _LANE)
    ap = _round_up(audio_dim, _LANE)
    tp = _round_up(text_dim, _LANE)
    fp = _round_up(fused_dim, _LANE)
    hp = _round_up(hidden_dim, _LANE)
    cp = _round_up(num_classes, _LANE)

    # Batch tiling: multiple of 16 sublanes (bf16 packing); aim for >=2 grid
    # steps so the pipeline double-buffers activations and v7x's 2 TCs both run.
    if block_b is None:
        block_b = min(256, max(_SUBLANE_BF16,
                               _round_up(pl.cdiv(B, 2), _SUBLANE_BF16)))
    bp = _round_up(max(B, block_b), block_b)
    grid = (bp // block_b,)

    bf16, f32 = jnp.bfloat16, jnp.float32

    # Activations: bf16 (halves HBM->VMEM bytes), zero-padded on batch & features.
    img = _pad2d(image_feat.astype(bf16), bp, ip)
    aud = _pad2d(audio_feat.astype(bf16), bp, ap)
    txt = _pad2d(text_feat.astype(bf16), bp, tp)

    # Weights: bf16 (f32 accumulation in the kernel); biases stay f32.
    wi = _pad2d(params["wi"].astype(bf16), ip, fp)
    wa = _pad2d(params["wa"].astype(bf16), ap, fp)
    wt = _pad2d(params["wt"].astype(bf16), tp, fp)
    bi = _pad2d(params["bi"].astype(f32), 1, fp)
    ba = _pad2d(params["ba"].astype(f32), 1, fp)
    bt = _pad2d(params["bt"].astype(f32), 1, fp)
    ca1_w = _pad2d(params["ca1_w"].astype(bf16), fp, hp)
    ca1_b = _pad2d(params["ca1_b"].astype(f32), 1, hp)
    ca2_w = _pad2d(params["ca2_w"].astype(bf16), hp, fp)
    ca2_b = _pad2d(params["ca2_b"].astype(f32), 1, fp)
    cls_w = _pad2d(params["cls_w"].astype(bf16), fp, cp)
    cls_b = _pad2d(params["cls_b"].astype(f32), 1, cp)

    # 3-way softmax over the learned modality weights (parameter-only glue).
    norm_weights = jax.nn.softmax(params["weights"].astype(f32), axis=0)

    act_spec = lambda d: pl.BlockSpec((block_b, d), lambda i: (i, 0))
    # Constant index_map => weights/biases are DMA'd once and stay resident
    # across the whole batch grid.  (If VMEM ever becomes binding on v7x,
    # pipeline_mode=pl.Buffered(1) on these specs halves their footprint.)
    const_spec = lambda shape: pl.BlockSpec(shape, lambda i: (0, 0))

    in_specs = [
        pl.BlockSpec(memory_space=pltpu.MemorySpace.SMEM),     # norm_weights (3,)
        act_spec(ip), act_spec(ap), act_spec(tp),              # activations
        const_spec((ip, fp)), const_spec((1, fp)),             # image proj
        const_spec((ap, fp)), const_spec((1, fp)),             # audio proj
        const_spec((tp, fp)), const_spec((1, fp)),             # text proj
        const_spec((fp, hp)), const_spec((1, hp)),             # channel attn 1
        const_spec((hp, fp)), const_spec((1, fp)),             # channel attn 2
        const_spec((fp, cp)), const_spec((1, cp)),             # classifier
    ]
    out_specs = pl.BlockSpec((block_b, cp), lambda i: (i, 0))

    # Explicit VMEM budget so the same tiling fits v7x's 64 MiB as well as
    # v5e/v6e's 128 MiB (stay well under the 48 MiB mark).
    weight_bytes = 2 * (ip * fp + ap * fp + tp * fp + fp * hp + hp * fp + fp * cp)
    bias_bytes = 4 * (3 * fp + hp + fp + cp)
    act_bytes = 2 * 2 * block_b * (ip + ap + tp)   # double-buffered bf16 tiles
    out_bytes = 2 * 4 * block_b * cp               # double-buffered f32 tiles
    vmem_needed = 2 * (weight_bytes + bias_bytes) + act_bytes + out_bytes
    vmem_limit = int(min(max(2 * vmem_needed, 16 * 2**20), 48 * 2**20))

    logits = pl.pallas_call(
        _fusion_kernel,
        out_shape=jax.ShapeDtypeStruct((bp, cp), f32),
        grid_spec=pltpu.PrefetchScalarGridSpec(
            num_scalar_prefetch=0,
            grid=grid,
            in_specs=in_specs,
            out_specs=out_specs,
        ),
        compiler_params=pltpu.CompilerParams(
            dimension_semantics=("parallel",),
            vmem_limit_bytes=vmem_limit,
        ),
    )(
        norm_weights,
        img, aud, txt,
        wi, bi, wa, ba, wt, bt,
        ca1_w, ca1_b, ca2_w, ca2_b, cls_w, cls_b,
    )
    return logits[:B, :num_classes], norm_weights


def _reference(image_feat, audio_feat, text_feat, params):
    """Pure-JAX reference mirroring the kernel's dtype policy
    (bf16 matmul inputs, f32 accumulation; eval-mode PyTorch semantics)."""
    bf16, f32 = jnp.bfloat16, jnp.float32
    dot = lambda x, w: jnp.dot(x.astype(bf16), w.astype(bf16),
                               preferred_element_type=f32)
    relu = lambda x: jnp.maximum(x, 0.0)
    img_p = relu(dot(image_feat, params["wi"]) + params["bi"])
    aud_p = relu(dot(audio_feat, params["wa"]) + params["ba"])
    txt_p = relu(dot(text_feat, params["wt"]) + params["bt"])
    nw = jax.nn.softmax(params["weights"], axis=0)
    fused = nw[0] * img_p + nw[1] * aud_p + nw[2] * txt_p
    hidden = relu(dot(fused, params["ca1_w"]) + params["ca1_b"])
    attn = jax.nn.sigmoid(dot(hidden, params["ca2_w"]) + params["ca2_b"])
    fused = fused * attn
    logits = dot(relu(fused), params["cls_w"]) + params["cls_b"]
    return logits, nw


def _init_params(key, image_dim, audio_dim, text_dim, fused_dim, reduction,
                 num_classes):
    hidden = fused_dim // reduction
    ks = jax.random.split(key, 8)

    def lin(k, fan_in, fan_out):
        scale = 1.0 / jnp.sqrt(jnp.float32(fan_in))
        return jax.random.uniform(k, (fan_in, fan_out), jnp.float32, -scale, scale)

    return {
        "wi": lin(ks[0], image_dim, fused_dim), "bi": jnp.zeros((1, fused_dim), jnp.float32),
        "wa": lin(ks[1], audio_dim, fused_dim), "ba": jnp.zeros((1, fused_dim), jnp.float32),
        "wt": lin(ks[2], text_dim, fused_dim),  "bt": jnp.zeros((1, fused_dim), jnp.float32),
        "ca1_w": lin(ks[3], fused_dim, hidden), "ca1_b": jnp.zeros((1, hidden), jnp.float32),
        "ca2_w": lin(ks[4], hidden, fused_dim), "ca2_b": jnp.zeros((1, fused_dim), jnp.float32),
        "cls_w": lin(ks[5], fused_dim, num_classes),
        "cls_b": jnp.zeros((1, num_classes), jnp.float32),
        # nn.Parameter(torch.ones(3)) -> perturb slightly so softmax is non-trivial
        "weights": jnp.ones((3,), jnp.float32) + 0.1 * jax.random.normal(ks[6], (3,)),
    }


if __name__ == "__main__":
    # Small shapes consistent with the module (scaled-down dims).
    B = 32
    image_dim, audio_dim, text_dim = 64, 32, 48
    fused_dim, reduction, num_classes = 64, 16, 16

    key = jax.random.PRNGKey(0)
    k_img, k_aud, k_txt, k_par = jax.random.split(key, 4)

    image_feat = jax.random.normal(k_img, (B, image_dim), jnp.float32)
    audio_feat = jax.random.normal(k_aud, (B, audio_dim), jnp.float32)
    text_feat = jax.random.normal(k_txt, (B, text_dim), jnp.float32)
    params = _init_params(k_par, image_dim, audio_dim, text_dim,
                          fused_dim, reduction, num_classes)

    logits, norm_weights = multimodal_weighted_fusion(
        image_feat, audio_feat, text_feat, params)
    jax.block_until_ready((logits, norm_weights))

    ref_logits, ref_nw = _reference(image_feat, audio_feat, text_feat, params)
    assert logits.shape == (B, num_classes)
    assert norm_weights.shape == (3,)
    assert jnp.allclose(logits, ref_logits, atol=1e-2, rtol=1e-2), \
        float(jnp.max(jnp.abs(logits - ref_logits)))
    assert jnp.allclose(norm_weights, ref_nw, atol=1e-6)

    print("KERNEL_OK")
</pallas_src>

<mosaic_0001>
module attributes {stable_mosaic.version = 11 : i64} {
  func.func @_fusion_kernel(%arg0: i32, %arg1: memref<3xf32, #tpu.memory_space<smem>>, %arg2: memref<16x128xbf16, #tpu.memory_space<vmem>>, %arg3: memref<16x128xbf16, #tpu.memory_space<vmem>>, %arg4: memref<16x128xbf16, #tpu.memory_space<vmem>>, %arg5: memref<128x128xbf16, #tpu.memory_space<vmem>>, %arg6: memref<1x128xf32, #tpu.memory_space<vmem>>, %arg7: memref<128x128xbf16, #tpu.memory_space<vmem>>, %arg8: memref<1x128xf32, #tpu.memory_space<vmem>>, %arg9: memref<128x128xbf16, #tpu.memory_space<vmem>>, %arg10: memref<1x128xf32, #tpu.memory_space<vmem>>, %arg11: memref<128x128xbf16, #tpu.memory_space<vmem>>, %arg12: memref<1x128xf32, #tpu.memory_space<vmem>>, %arg13: memref<128x128xbf16, #tpu.memory_space<vmem>>, %arg14: memref<1x128xf32, #tpu.memory_space<vmem>>, %arg15: memref<128x128xbf16, #tpu.memory_space<vmem>>, %arg16: memref<1x128xf32, #tpu.memory_space<vmem>>, %arg17: memref<16x128xf32, #tpu.memory_space<vmem>>) attributes {dimension_semantics = [#tpu.dimension_semantics<parallel>], iteration_bounds = array<i64: 2>, scalar_prefetch = 0 : i64, scratch_operands = 0 : i64, tpu.core_type = #tpu.core_type<tc>, window_params = [{transform_indices = @transform_0, window_bounds = array<i64: 3>}, {transform_indices = @transform_1, window_bounds = array<i64: 16, 128>}, {transform_indices = @transform_2, window_bounds = array<i64: 16, 128>}, {transform_indices = @transform_3, window_bounds = array<i64: 16, 128>}, {pipeline_mode = #tpu.pipeline_mode<synchronous>, transform_indices = @transform_4, window_bounds = array<i64: 128, 128>}, {pipeline_mode = #tpu.pipeline_mode<synchronous>, transform_indices = @transform_5, window_bounds = array<i64: 1, 128>}, {pipeline_mode = #tpu.pipeline_mode<synchronous>, transform_indices = @transform_6, window_bounds = array<i64: 128, 128>}, {pipeline_mode = #tpu.pipeline_mode<synchronous>, transform_indices = @transform_7, window_bounds = array<i64: 1, 128>}, {pipeline_mode = #tpu.pipeline_mode<synchronous>, transform_indices = @transform_8, window_bounds = array<i64: 128, 128>}, {pipeline_mode = #tpu.pipeline_mode<synchronous>, transform_indices = @transform_9, window_bounds = array<i64: 1, 128>}, {pipeline_mode = #tpu.pipeline_mode<synchronous>, transform_indices = @transform_10, window_bounds = array<i64: 128, 128>}, {pipeline_mode = #tpu.pipeline_mode<synchronous>, transform_indices = @transform_11, window_bounds = array<i64: 1, 128>}, {pipeline_mode = #tpu.pipeline_mode<synchronous>, transform_indices = @transform_12, window_bounds = array<i64: 128, 128>}, {pipeline_mode = #tpu.pipeline_mode<synchronous>, transform_indices = @transform_13, window_bounds = array<i64: 1, 128>}, {pipeline_mode = #tpu.pipeline_mode<synchronous>, transform_indices = @transform_14, window_bounds = array<i64: 128, 128>}, {pipeline_mode = #tpu.pipeline_mode<synchronous>, transform_indices = @transform_15, window_bounds = array<i64: 1, 128>}, {transform_indices = @transform_16, window_bounds = array<i64: 16, 128>}]} {
    %c0 = arith.constant 0 : index
    %c0_0 = arith.constant 0 : index
    %0 = vector.load %arg2[%c0, %c0_0] : memref<16x128xbf16, #tpu.memory_space<vmem>>, vector<16x128xbf16>
    %c0_1 = arith.constant 0 : index
    %c0_2 = arith.constant 0 : index
    %1 = vector.load %arg5[%c0_1, %c0_2] : memref<128x128xbf16, #tpu.memory_space<vmem>>, vector<128x128xbf16>
    %cst = arith.constant dense<0.000000e+00> : vector<16x128xf32>
    %2 = tpu.matmul %0, %1, %cst {dimension_numbers = #tpu.dot_dimension_numbers<[1], [0], [0], [1], [0, 0, 1, 1], [], []>} : vector<16x128xbf16>, vector<128x128xbf16>, vector<16x128xf32> -> vector<16x128xf32>
    %c0_3 = arith.constant 0 : index
    %c0_4 = arith.constant 0 : index
    %3 = vector.load %arg6[%c0_3, %c0_4] : memref<1x128xf32, #tpu.memory_space<vmem>>, vector<1x128xf32>
    %4 = vector.broadcast %3 : vector<1x128xf32> to vector<16x128xf32>
    %5 = arith.addf %2, %4 : vector<16x128xf32>
    %cst_5 = arith.constant 0.000000e+00 : f32
    %6 = vector.broadcast %cst_5 : f32 to vector<16x128xf32>
    %7 = arith.maximumf %5, %6 : vector<16x128xf32>
    %c0_6 = arith.constant 0 : index
    %c0_7 = arith.constant 0 : index
    %8 = vector.load %arg3[%c0_6, %c0_7] : memref<16x128xbf16, #tpu.memory_space<vmem>>, vector<16x128xbf16>
    %c0_8 = arith.constant 0 : index
    %c0_9 = arith.constant 0 : index
    %9 = vector.load %arg7[%c0_8, %c0_9] : memref<128x128xbf16, #tpu.memory_space<vmem>>, vector<128x128xbf16>
    %cst_10 = arith.constant dense<0.000000e+00> : vector<16x128xf32>
    %10 = tpu.matmul %8, %9, %cst_10 {dimension_numbers = #tpu.dot_dimension_numbers<[1], [0], [0], [1], [0, 0, 1, 1], [], []>} : vector<16x128xbf16>, vector<128x128xbf16>, vector<16x128xf32> -> vector<16x128xf32>
    %c0_11 = arith.constant 0 : index
    %c0_12 = arith.constant 0 : index
    %11 = vector.load %arg8[%c0_11, %c0_12] : memref<1x128xf32, #tpu.memory_space<vmem>>, vector<1x128xf32>
    %12 = vector.broadcast %11 : vector<1x128xf32> to vector<16x128xf32>
    %13 = arith.addf %10, %12 : vector<16x128xf32>
    %cst_13 = arith.constant 0.000000e+00 : f32
    %14 = vector.broadcast %cst_13 : f32 to vector<16x128xf32>
    %15 = arith.maximumf %13, %14 : vector<16x128xf32>
    %c0_14 = arith.constant 0 : index
    %c0_15 = arith.constant 0 : index
    %16 = vector.load %arg4[%c0_14, %c0_15] : memref<16x128xbf16, #tpu.memory_space<vmem>>, vector<16x128xbf16>
    %c0_16 = arith.constant 0 : index
    %c0_17 = arith.constant 0 : index
    %17 = vector.load %arg9[%c0_16, %c0_17] : memref<128x128xbf16, #tpu.memory_space<vmem>>, vector<128x128xbf16>
    %cst_18 = arith.constant dense<0.000000e+00> : vector<16x128xf32>
    %18 = tpu.matmul %16, %17, %cst_18 {dimension_numbers = #tpu.dot_dimension_numbers<[1], [0], [0], [1], [0, 0, 1, 1], [], []>} : vector<16x128xbf16>, vector<128x128xbf16>, vector<16x128xf32> -> vector<16x128xf32>
    %c0_19 = arith.constant 0 : index
    %c0_20 = arith.constant 0 : index
    %19 = vector.load %arg10[%c0_19, %c0_20] : memref<1x128xf32, #tpu.memory_space<vmem>>, vector<1x128xf32>
    %20 = vector.broadcast %19 : vector<1x128xf32> to vector<16x128xf32>
    %21 = arith.addf %18, %20 : vector<16x128xf32>
    %cst_21 = arith.constant 0.000000e+00 : f32
    %22 = vector.broadcast %cst_21 : f32 to vector<16x128xf32>
    %23 = arith.maximumf %21, %22 : vector<16x128xf32>
    %c0_22 = arith.constant 0 : index
    %24 = memref.load %arg1[%c0_22] : memref<3xf32, #tpu.memory_space<smem>>
    %c1 = arith.constant 1 : index
    %25 = memref.load %arg1[%c1] : memref<3xf32, #tpu.memory_space<smem>>
    %c2 = arith.constant 2 : index
    %26 = memref.load %arg1[%c2] : memref<3xf32, #tpu.memory_space<smem>>
    %27 = vector.broadcast %24 : f32 to vector<16x128xf32>
    %28 = arith.mulf %27, %7 : vector<16x128xf32>
    %29 = vector.broadcast %25 : f32 to vector<16x128xf32>
    %30 = arith.mulf %29, %15 : vector<16x128xf32>
    %31 = arith.addf %28, %30 : vector<16x128xf32>
    %32 = vector.broadcast %26 : f32 to vector<16x128xf32>
    %33 = arith.mulf %32, %23 : vector<16x128xf32>
    %34 = arith.addf %31, %33 : vector<16x128xf32>
    %35 = arith.truncf %34 : vector<16x128xf32> to vector<16x128xbf16>
    %c0_23 = arith.constant 0 : index
    %c0_24 = arith.constant 0 : index
    %36 = vector.load %arg11[%c0_23, %c0_24] : memref<128x128xbf16, #tpu.memory_space<vmem>>, vector<128x128xbf16>
    %cst_25 = arith.constant dense<0.000000e+00> : vector<16x128xf32>
    %37 = tpu.matmul %35, %36, %cst_25 {dimension_numbers = #tpu.dot_dimension_numbers<[1], [0], [0], [1], [0, 0, 1, 1], [], []>} : vector<16x128xbf16>, vector<128x128xbf16>, vector<16x128xf32> -> vector<16x128xf32>
    %c0_26 = arith.constant 0 : index
    %c0_27 = arith.constant 0 : index
    %38 = vector.load %arg12[%c0_26, %c0_27] : memref<1x128xf32, #tpu.memory_space<vmem>>, vector<1x128xf32>
    %39 = vector.broadcast %38 : vector<1x128xf32> to vector<16x128xf32>
    %40 = arith.addf %37, %39 : vector<16x128xf32>
    %cst_28 = arith.constant 0.000000e+00 : f32
    %41 = vector.broadcast %cst_28 : f32 to vector<16x128xf32>
    %42 = arith.maximumf %40, %41 : vector<16x128xf32>
    %43 = arith.truncf %42 : vector<16x128xf32> to vector<16x128xbf16>
    %c0_29 = arith.constant 0 : index
    %c0_30 = arith.constant 0 : index
    %44 = vector.load %arg13[%c0_29, %c0_30] : memref<128x128xbf16, #tpu.memory_space<vmem>>, vector<128x128xbf16>
    %cst_31 = arith.constant dense<0.000000e+00> : vector<16x128xf32>
    %45 = tpu.matmul %43, %44, %cst_31 {dimension_numbers = #tpu.dot_dimension_numbers<[1], [0], [0], [1], [0, 0, 1, 1], [], []>} : vector<16x128xbf16>, vector<128x128xbf16>, vector<16x128xf32> -> vector<16x128xf32>
    %c0_32 = arith.constant 0 : index
    %c0_33 = arith.constant 0 : index
    %46 = vector.load %arg14[%c0_32, %c0_33] : memref<1x128xf32, #tpu.memory_space<vmem>>, vector<1x128xf32>
    %47 = vector.broadcast %46 : vector<1x128xf32> to vector<16x128xf32>
    %48 = arith.addf %45, %47 : vector<16x128xf32>
    %49 = arith.negf %48 : vector<16x128xf32>
    %50 = math.exp %49 : vector<16x128xf32>
    %cst_34 = arith.constant 1.000000e+00 : f32
    %51 = vector.broadcast %cst_34 : f32 to vector<16x128xf32>
    %52 = arith.addf %51, %50 : vector<16x128xf32>
    %53 = arith.divf %51, %52 : vector<16x128xf32>
    %54 = arith.mulf %34, %53 : vector<16x128xf32>
    %cst_35 = arith.constant 0.000000e+00 : f32
    %55 = vector.broadcast %cst_35 : f32 to vector<16x128xf32>
    %56 = arith.maximumf %54, %55 : vector<16x128xf32>
    %57 = arith.truncf %56 : vector<16x128xf32> to vector<16x128xbf16>
    %c0_36 = arith.constant 0 : index
    %c0_37 = arith.constant 0 : index
    %58 = vector.load %arg15[%c0_36, %c0_37] : memref<128x128xbf16, #tpu.memory_space<vmem>>, vector<128x128xbf16>
    %cst_38 = arith.constant dense<0.000000e+00> : vector<16x128xf32>
    %59 = tpu.matmul %57, %58, %cst_38 {dimension_numbers = #tpu.dot_dimension_numbers<[1], [0], [0], [1], [0, 0, 1, 1], [], []>} : vector<16x128xbf16>, vector<128x128xbf16>, vector<16x128xf32> -> vector<16x128xf32>
    %c0_39 = arith.constant 0 : index
    %c0_40 = arith.constant 0 : index
    %60 = vector.load %arg16[%c0_39, %c0_40] : memref<1x128xf32, #tpu.memory_space<vmem>>, vector<1x128xf32>
    %61 = vector.broadcast %60 : vector<1x128xf32> to vector<16x128xf32>
    %62 = arith.addf %59, %61 : vector<16x128xf32>
    %c0_41 = arith.constant 0 : index
    %c0_42 = arith.constant 0 : index
    %63 = vector.load %arg17[%c0_41, %c0_42] : memref<16x128xf32, #tpu.memory_space<vmem>>, vector<16x128xf32>
    tpu.vector_store %arg17[%c0_41, %c0_42], %62 {strides = array<i32>} : memref<16x128xf32, #tpu.memory_space<vmem>>, vector<16x128xf32>,
    return
  }
  func.func @transform_0(%arg0: i32) -> i32 {
    %c0_i32 = arith.constant 0 : i32
    %c0_i32_0 = arith.constant 0 : i32
    return %c0_i32 : i32
  }
  func.func @transform_1(%arg0: i32) -> (i32, i32) {
    %c0_i32 = arith.constant 0 : i32
    %c0_i32_0 = arith.constant 0 : i32
    return %arg0, %c0_i32 : i32, i32
  }
  func.func @transform_2(%arg0: i32) -> (i32, i32) {
    %c0_i32 = arith.constant 0 : i32
    %c0_i32_0 = arith.constant 0 : i32
    return %arg0, %c0_i32 : i32, i32
  }
  func.func @transform_3(%arg0: i32) -> (i32, i32) {
    %c0_i32 = arith.constant 0 : i32
    %c0_i32_0 = arith.constant 0 : i32
    return %arg0, %c0_i32 : i32, i32
  }
  func.func @transform_4(%arg0: i32) -> (i32, i32) {
    %c0_i32 = arith.constant 0 : i32
    %c0_i32_0 = arith.constant 0 : i32
    %c0_i32_1 = arith.constant 0 : i32
    return %c0_i32, %c0_i32_0 : i32, i32
  }
  func.func @transform_5(%arg0: i32) -> (i32, i32) {
    %c0_i32 = arith.constant 0 : i32
    %c0_i32_0 = arith.constant 0 : i32
    %c0_i32_1 = arith.constant 0 : i32
    return %c0_i32, %c0_i32_0 : i32, i32
  }
  func.func @transform_6(%arg0: i32) -> (i32, i32) {
    %c0_i32 = arith.constant 0 : i32
    %c0_i32_0 = arith.constant 0 : i32
    %c0_i32_1 = arith.constant 0 : i32
    return %c0_i32, %c0_i32_0 : i32, i32
  }
  func.func @transform_7(%arg0: i32) -> (i32, i32) {
    %c0_i32 = arith.constant 0 : i32
    %c0_i32_0 = arith.constant 0 : i32
    %c0_i32_1 = arith.constant 0 : i32
    return %c0_i32, %c0_i32_0 : i32, i32
  }
  func.func @transform_8(%arg0: i32) -> (i32, i32) {
    %c0_i32 = arith.constant 0 : i32
    %c0_i32_0 = arith.constant 0 : i32
    %c0_i32_1 = arith.constant 0 : i32
    return %c0_i32, %c0_i32_0 : i32, i32
  }
  func.func @transform_9(%arg0: i32) -> (i32, i32) {
    %c0_i32 = arith.constant 0 : i32
    %c0_i32_0 = arith.constant 0 : i32
    %c0_i32_1 = arith.constant 0 : i32
    return %c0_i32, %c0_i32_0 : i32, i32
  }
  func.func @transform_10(%arg0: i32) -> (i32, i32) {
    %c0_i32 = arith.constant 0 : i32
    %c0_i32_0 = arith.constant 0 : i32
    %c0_i32_1 = arith.constant 0 : i32
    return %c0_i32, %c0_i32_0 : i32, i32
  }
  func.func @transform_11(%arg0: i32) -> (i32, i32) {
    %c0_i32 = arith.constant 0 : i32
    %c0_i32_0 = arith.constant 0 : i32
    %c0_i32_1 = arith.constant 0 : i32
    return %c0_i32, %c0_i32_0 : i32, i32
  }
  func.func @transform_12(%arg0: i32) -> (i32, i32) {
    %c0_i32 = arith.constant 0 : i32
    %c0_i32_0 = arith.constant 0 : i32
    %c0_i32_1 = arith.constant 0 : i32
    return %c0_i32, %c0_i32_0 : i32, i32
  }
  func.func @transform_13(%arg0: i32) -> (i32, i32) {
    %c0_i32 = arith.constant 0 : i32
    %c0_i32_0 = arith.constant 0 : i32
    %c0_i32_1 = arith.constant 0 : i32
    return %c0_i32, %c0_i32_0 : i32, i32
  }
  func.func @transform_14(%arg0: i32) -> (i32, i32) {
    %c0_i32 = arith.constant 0 : i32
    %c0_i32_0 = arith.constant 0 : i32
    %c0_i32_1 = arith.constant 0 : i32
    return %c0_i32, %c0_i32_0 : i32, i32
  }
  func.func @transform_15(%arg0: i32) -> (i32, i32) {
    %c0_i32 = arith.constant 0 : i32
    %c0_i32_0 = arith.constant 0 : i32
    %c0_i32_1 = arith.constant 0 : i32
    return %c0_i32, %c0_i32_0 : i32, i32
  }
  func.func @transform_16(%arg0: i32) -> (i32, i32) {
    %c0_i32 = arith.constant 0 : i32
    %c0_i32_0 = arith.constant 0 : i32
    return %arg0, %c0_i32 : i32, i32
  }
}

</mosaic_0001>

<bundles_post_ra>
// kernel: tpu_custom_call.1
= control target key start
LH: loop header
LB: loop body
LE: loop exit
PB: predicated region body
PF: predicated region fallthrough
CT: control target
= control target key end

     0   :  { %s3142_s0 = inlined_call_operand.hbm [shape: f32[3], index: 0, kind: input, shape index: {}]   ;;  %s3143_s1 = inlined_call_operand.hbm [shape: bf16[32,128], index: 1, kind: input, shape index: {}]   ;;  %s3144_s2 = inlined_call_operand.hbm [shape: bf16[32,128], index: 2, kind: input, shape index: {}]   ;;  %s3145_s3 = inlined_call_operand.hbm [shape: bf16[32,128], index: 3, kind: input, shape index: {}]   ;;  %s3146_s4 = inlined_call_operand.hbm [shape: bf16[128,128], index: 4, kind: input, shape index: {}]   ;;  %s3147_s5 = inlined_call_operand.vmem [shape: f32[1,128], index: 5, kind: input, shape index: {}]   ;;  %s3148_s6 = inlined_call_operand.hbm [shape: bf16[128,128], index: 6, kind: input, shape index: {}]   ;;  %s3149_s7 = inlined_call_operand.vmem [shape: f32[1,128], index: 7, kind: input, shape index: {}]   ;;  %s3150_s8 = inlined_call_operand.hbm [shape: bf16[128,128], index: 8, kind: input, shape index: {}]   ;;  %s3151_s9 = inlined_call_operand.vmem [shape: f32[1,128], index: 9, kind: input, shape index: {}]   ;;  %s3152_s10 = inlined_call_operand.hbm [shape: bf16[128,128], index: 10, kind: input, shape index: {}]   ;;  %s3153_s11 = inlined_call_operand.vmem [shape: f32[1,128], index: 11, kind: input, shape index: {}]   ;;  %s3154_s12 = inlined_call_operand.hbm [shape: bf16[128,128], index: 12, kind: input, shape index: {}]   ;;  %s3155_s13 = inlined_call_operand.vmem [shape: f32[1,128], index: 13, kind: input, shape index: {}]   ;;  %s3156_s14 = inlined_call_operand.hbm [shape: bf16[128,128], index: 14, kind: input, shape index: {}]   ;;  %s3157_s15 = inlined_call_operand.vmem [shape: f32[1,128], index: 15, kind: input, shape index: {}]   ;;  %s3158_s16 = inlined_call_operand.hbm [shape: f32[32,128], index: 16, kind: output, shape index: {}]  }
   0x1   :  { %3187 = sst [smem:[#allocation34_spill]] %s3142_s0 }
   0x2   :  { %3188 = sst [smem:[#allocation35_spill]] %s3144_s2 }
   0x3   :  { %3189 = sst [smem:[#allocation36_spill]] %s3146_s4 }
   0x4   :  { %3190 = sst [smem:[#allocation37_spill]] %s3147_s5 }
   0x5   :  { %3191 = sst [smem:[#allocation38_spill]] %s3148_s6 }
   0x6   :  { %3192 = sst [smem:[#allocation39_spill]] %s3149_s7 }
   0x7   :  { %3193 = sst [smem:[#allocation40_spill]] %s3150_s8 }
   0x8   :  { %3194 = sst [smem:[#allocation41_spill]] %s3151_s9 }
   0x9   :  { %3195 = sst [smem:[#allocation42_spill]] %s3153_s11 }
   0xa   :  { %3196 = sst [smem:[#allocation43_spill]] %s3154_s12 }
   0xb   :  { %3197 = sst [smem:[#allocation44_spill]] %s3155_s13 }
   0xc   :  { %3198 = sst [smem:[#allocation45_spill]] %s3157_s15 }
   0xd   :  { %3199 = sst [smem:[#allocation46_spill]] %s3158_s16 }
   0xe   :  { %21 = vsyncpa [#allocation5], 0 }
   0xf   :  { %22 = vsyncpa [#allocation3], 0 }
  0x10   :  { %24 = vsyncpa [#allocation3 + $0x1], 0 }
  0x11   :  { %25 = vsyncpa [#allocation8], 0 }
  0x12   :  { %27 = vsyncpa [#allocation8 + $0x1], 0 }
  0x13   :  { %28 = vsyncpa [#allocation11], 0 }
  0x14   :  { %29 = vsyncpa [#allocation14], 0 }
  0x15   :  { %30 = vsyncpa [#allocation17], 0 }
  0x16   :  { %31 = vsyncpa [#allocation4], 0 }
  0x17   :  { %33 = vsyncpa [#allocation4 + $0x1], 0  ;;  %s2589_s21 = smov 0   ;;  %s2591_s22 = smov 0  }
  0x18   :  { %s2593_s23 = smov 0   ;;  %s2595_s24 = smov 0  }
  0x19 LB: > { %3200 = sst [smem:[#allocation27_spill]] %s2473_s21  ;;  %s2487_s25 = smov [#allocation10]   ;;  %s2485_s24 = sphi %s2595_s24, %s3253_s24   ;;  %s2481_s23 = sphi %s2593_s23, %s3257_s23   ;;  %s2477_s22 = sphi %s2591_s22, %s3256_s22   ;;  %s2473_s21 = sphi %s2589_s21, %s3255_s21  }
  0x1a   : > { %3201 = sst [smem:[#allocation28_spill]] %s2485_s24  ;;  %s442_s26 = sshll.u32 %s2487_s25, 4  ;;  %s2615_s26 = int_to_ptr.vmem [resolvable:$true] %s442_s26 }
  0x1b   : > { %s2610_s27 = sadd.s32 4294967295, %s2485_s24   ;;  %p1662_p0 = scmp.ge.s32.totalorder %s2485_s24, 1 }
  0x1c   : > { %p3169_p1 = scmp.eq.s32.totalorder %s2610_s27, 0  ;;  %p421_p2 = scmp.lt.s32.totalorder %s2485_s24, 3 }
  0x1d   : > { %s2488_s29 = smov [#allocation13]   ;;  %s2489_s17 = smov [#allocation16]  }
  0x1e   : > { %p2617_p3 = pnand %p1662_p0, %p421_p2  ;;  %s474_s30 = sshll.u32 %s2488_s29, 4  ;;  %s2630_s30 = int_to_ptr.vmem [resolvable:$true] %s474_s30 }
  0x1f   : > { %s506_s18 = sshll.u32 %s2489_s17, 4  ;;  %s3204_s4 = sld [smem:[#allocation36_spill]]  ;;  %s2632_s18 = int_to_ptr.vmem [resolvable:$true] %s506_s18 }
  0x20   : > { %s3202_s28 = scalar_select %p2617_p3, 1, 0 }
  0x21   : > { %p1972_p5 = pneg %p2617_p3 }
  0x23   : > { %p2626_p6 = pnand %p1972_p5, %p3169_p1 }
  0x25   : > { %s3203_s0 = scalar_select %p2626_p6, 1, 0 }
  0x26   : > { %s2128_s25 = scalar_lea.hbm %s3204_s4, 1024  ;;  %p2642_p8 = pneg %p2626_p6 }
  0x27   : > { %p2129_p7 = scmp.ne.s32.totalorder %s3204_s4, %s2128_s25  ;;  %p2135_p11 = scmp.lt.u32.totalorder %s2128_s25, %s3204_s4 }
  0x28   : > { %s3205_s29 = scalar_select %p2642_p8, 1, 0 }
  0x29   : > { %p2131_p9 = pnand %p2642_p8, %p2129_p7 }
  0x2b   : > { %p2132_p10 = pneg %p2131_p9 }
  0x2d   : > { %p2137_p12 = pnand %p2135_p11, %p2132_p10 }
  0x2f   : > { %2140 = shalt.err (!%p2137_p12)
}
  0x30   : > { %s2141_s15 = scalar_lea.vmem %s2615_s26, 1024  ;;  %p2149_p5 = scmp.lt.s32.totalorder %s2615_s26, %s2615_s26 }
  0x31   : > { %p2142_p13 = scmp.ne.s32.totalorder %s2615_s26, %s2141_s15  ;;  %p2150_p4 = scmp.lt.s32.totalorder %s2141_s15, %s2141_s15 }
  0x33   : > { %p2144_p0 = pnand %p2142_p13, %p2642_p8  ;;  %p2151_p7 = por %p2150_p4, %p2149_p5 }
  0x35   : > { %p2145_p2 = pneg %p2144_p0 }
  0x37   : > { %p2152_p9 = pnand %p2151_p7, %p2145_p2 }
  0x39   : > { %2155 = shalt.err (!%p2152_p9)
}
  0x3a   : > { %s3162_s16 = smov 64   ;;  %s3165_s13 = smov 4  }
  0x3b   : > { %1978 = dma.hbm_to_vmem [thread:$0]  (!%p2626_p6), %s3204_s4, 1024, %s2615_s26, [#allocation11], %s3162_s16, %s3162_s16, %s3165_s13  }
  0x3c   : > { %s3206_s8 = sld [smem:[#allocation40_spill]] }
  0x42   : > { %s2156_s15 = scalar_lea.hbm %s3206_s8, 1024 }
  0x43   : > { %p2157_p4 = scmp.ne.s32.totalorder %s3206_s8, %s2156_s15  ;;  %p2163_p12 = scmp.lt.u32.totalorder %s2156_s15, %s3206_s8 }
  0x45   : > { %p2159_p10 = pnand %p2157_p4, %p2642_p8 }
  0x47   : > { %p2160_p11 = pneg %p2159_p10 }
  0x49   : > { %p2165_p13 = pnand %p2163_p12, %p2160_p11 }
  0x4b   : > { %2168 = shalt.err (!%p2165_p13)
}
  0x4c   : > { %s2169_s26 = scalar_lea.vmem %s2630_s30, 1024  ;;  %p2177_p7 = scmp.lt.s32.totalorder %s2630_s30, %s2630_s30 }
  0x4d   : > { %p2170_p0 = scmp.ne.s32.totalorder %s2630_s30, %s2169_s26  ;;  %p2178_p9 = scmp.lt.s32.totalorder %s2169_s26, %s2169_s26 }
  0x4f   : > { %p2172_p2 = pnand %p2170_p0, %p2642_p8  ;;  %p2179_p4 = por %p2178_p9, %p2177_p7 }
  0x51   : > { %p2173_p5 = pneg %p2172_p2 }
  0x53   : > { %p2180_p10 = pnand %p2179_p4, %p2173_p5 }
  0x55   : > { %2183 = shalt.err (!%p2180_p10)
}
  0x56   : > { %1984 = dma.hbm_to_vmem [thread:$0]  (!%p2626_p6), %s3206_s8, 1024, %s2630_s30, [#allocation14], %s3162_s16, %s3162_s16, %s3165_s13  }
  0x57   : > { %s3207_s12 = sld [smem:[#allocation43_spill]] }
  0x5d   : > { %s2184_s19 = scalar_lea.hbm %s3207_s12, 1024 }
  0x5e   : > { %p2185_p11 = scmp.ne.s32.totalorder %s3207_s12, %s2184_s19  ;;  %p2191_p0 = scmp.lt.u32.totalorder %s2184_s19, %s3207_s12 }
  0x60   : > { %p2187_p12 = pnand %p2185_p11, %p2642_p8 }
  0x62   : > { %p2188_p13 = pneg %p2187_p12 }
  0x64   : > { %p2193_p2 = pnand %p2191_p0, %p2188_p13 }
  0x66   : > { %2196 = shalt.err (!%p2193_p2)
}
  0x67   : > { %s2197_s30 = scalar_lea.vmem %s2632_s18, 1024  ;;  %p2205_p4 = scmp.lt.s32.totalorder %s2632_s18, %s2632_s18 }
  0x68   : > { %p2198_p5 = scmp.ne.s32.totalorder %s2632_s18, %s2197_s30  ;;  %p2206_p10 = scmp.lt.s32.totalorder %s2197_s30, %s2197_s30 }
  0x6a   : > { %p2200_p7 = pnand %p2198_p5, %p2642_p8  ;;  %p2207_p11 = por %p2206_p10, %p2205_p4 }
  0x6c   : > { %p2201_p9 = pneg %p2200_p7 }
  0x6e   : > { %p2208_p12 = pnand %p2207_p11, %p2201_p9 }
  0x70   : > { %2211 = shalt.err (!%p2208_p12)
}
  0x71   : > { %1990 = dma.hbm_to_vmem [thread:$0]  (!%p2626_p6), %s3207_s12, 1024, %s2632_s18, [#allocation17], %s3162_s16, %s3162_s16, %s3165_s13  }
  0x72   : > { %s1661_s7 = sadd.s32 4294967294, %s2485_s24   ;;  %s2720_s9 = sadd.s32 1, %s2485_s24  }
  0x73   : > { %3208 = sst [smem:[#allocation29_spill]] %s2720_s9  ;;  %s67_s11 = sadd.s32 1, %s2481_s23 }
  0x74   : > { %s64_s19 = ssub.s32 %s2485_s24, %s2720_s9  ;;  %p74_p13 = scmp.ne.s32.totalorder %s2481_s23, %s2477_s22 }
  0x75   : > { %p65_p0 = scmp.eq.s32.totalorder %s64_s19, 0  ;;  %p75_p2 = scmp.eq.s32.totalorder %s2485_s24, 0 }
  0x76   : > { %p80_p5 = scmp.ne.s32.totalorder %s2477_s22, %s2473_s21  ;;  %p408_p7 = scmp.eq.s32.totalorder %s2610_s27, 1 }
  0x77   : > { %s2732_s20 = scalar_select %p65_p0, %s2481_s23, %s67_s11  }
  0x78   : > { %p76_p9 = por %p75_p2, %p74_p13  ;;  %p2736_p4 = por %p3169_p1, %p80_p5 }
  0x79   : > { %3209 = sst [smem:[#allocation30_spill]] %s2732_s20  ;;  %p2740_p10 = por %p408_p7, %p74_p13 }
  0x7a   : > { %s3210_s18 = scalar_select %p2736_p4, 1, 0 }
  0x7b   : > { %s3212_s25 = scalar_select %p2740_p10, 1, 0 }
  0x7c   : > { %3211 = sst [smem:[#allocation31_spill]] %s3210_s18  ;;  %p414_p11 = scmp.eq.s32.totalorder %s1661_s7, 1 }
  0x7d   : > { %3213 = sst [smem:[#allocation32_spill]] %s3212_s25  ;;  %p2015_p12 = scmp.lt.s32.totalorder %s2485_s24, 2 }
  0x7e   : > { %s3164_s17 = sand.u32 1, %s2481_s23   ;;  %p2746_p3 = por %p414_p11, %p80_p5 }
  0x7f   : > { %s2752_s30 = sshll.u32 %s3164_s17, 3  ;;  %s2755_s26 = sshll.u32 %s2485_s24, 7 }
  0x80   : > { %s3214_s15 = scalar_select %p2746_p3, 1, 0 }
  0x81   : > { %p2757_p0 = pnand %p2015_p12, %p76_p9  ;;  %s560_s11 = sand.u32 1, %s2485_s24  }
  0x82   : > { %3215 = sst [smem:[#allocation33_spill]] %s3214_s15  ;;  %s3217_s2 = sld [smem:[#allocation35_spill]] }
  0x83   : > { %s3216_s5 = scalar_select %p2757_p0, 1, 0 }
  0x84   : > { %s564_s17 = scalar_lea.vmem [#allocation7], %s2752_s30  ;;  %s2771_s4 = scalar_lea.sflag [#allocation8], %s560_s11 }
  0x85   : > { %s571_s13 = sshll.u32 %s564_s17, 4  ;;  %p2777_p2 = pneg %p2757_p0  ;;  %s2769_s13 = int_to_ptr.vmem [resolvable:$true] %s571_s13 }
  0x87   : > { %s3218_s12 = scalar_select %p2777_p2, 1, 0 }
  0x88   : > { %s2766_s16 = scalar_lea.hbm %s3217_s2, %s2755_s26  ;;  %s2217_s20 = scalar_lea.hbm %s3217_s2, 256 }
  0x89   : > { %s2212_s8 = scalar_lea.hbm %s2766_s16, 128  ;;  %p2218_p9 = scmp.lt.u32.totalorder %s2766_s16, %s3217_s2 }
  0x8a   : > { %p2213_p13 = scmp.ne.s32.totalorder %s2766_s16, %s2212_s8  ;;  %p2219_p11 = scmp.lt.u32.totalorder %s2217_s20, %s2212_s8 }
  0x8b   : > { %p2221_p1 = scmp.lt.u32.totalorder %s2212_s8, %s2766_s16 }
  0x8c   : > { %p2215_p5 = pnand %p2777_p2, %p2213_p13  ;;  %p2220_p12 = por %p2219_p11, %p2218_p9 }
  0x8e   : > { %p2216_p7 = pneg %p2215_p5  ;;  %p2222_p3 = por %p2221_p1, %p2220_p12 }
  0x90   : > { %p2223_p10 = pnand %p2222_p3, %p2216_p7 }
  0x92   : > { %2226 = shalt.err (!%p2223_p10)
}
  0x93   : > { %s2227_s11 = scalar_lea.vmem %s2769_s13, 128  ;;  %s2492_s7 = smov [#allocation7]  }
  0x94   : > { %p2228_p13 = scmp.ne.s32.totalorder %s2769_s13, %s2227_s11  ;;  %s2232_s19 = sshll.u32 %s2492_s7, 4  ;;  %s2233_s19 = int_to_ptr.vmem [resolvable:$false] %s2232_s19 }
  0x95   : > { %s2234_s9 = scalar_lea.vmem %s2233_s19, 256  ;;  %p2235_p6 = scmp.lt.s32.totalorder %s2769_s13, %s2233_s19 }
  0x96   : > { %p2230_p5 = pnand %p2228_p13, %p2777_p2  ;;  %p2236_p8 = scmp.lt.s32.totalorder %s2234_s9, %s2227_s11 }
  0x98   : > { %p2231_p4 = pneg %p2230_p5  ;;  %p2237_p9 = por %p2236_p8, %p2235_p6 }
  0x9a   : > { %p2238_p11 = pnand %p2237_p9, %p2231_p4 }
  0x9c   : > { %2241 = shalt.err (!%p2238_p11)
}
  0x9d   : > { %s3219_s8 = smov 4   ;;  %s3220_s20 = smov 64  }
  0x9e   : > { %2000 = dma.hbm_to_vmem [thread:$0]  (!%p2757_p0), %s2766_s16, 128, %s2769_s13, %s2771_s4, %s3220_s20, %s3220_s20, %s3219_s8  }
  0x9f   : > { %s3221_s7 = sld [smem:[#allocation34_spill]]  ;;  %p3222_p3 = scmp.ne.s32.totalorder %s3205_s29, 0 }
  0xa5   : > { %s2242_s24 = scalar_lea.hbm %s3221_s7, 16 }
  0xa6   : > { %p2243_p1 = scmp.ne.s32.totalorder %s3221_s7, %s2242_s24  ;;  %p2249_p4 = scmp.lt.u32.totalorder %s2242_s24, %s3221_s7 }
  0xa8   : > { %p2245_p6 = pnand %p2243_p1, %p3222_p3 }
  0xaa   : > { %p2246_p8 = pneg %p2245_p6 }
  0xac   : > { %p2251_p10 = pnand %p2249_p4, %p2246_p8 }
  0xae   : > { %2254 = shalt.err (!%p2251_p10)
}
  0xaf   : > { %s2493_s21 = smov [#allocation2]   ;;  %p3223_p7 = scmp.ne.s32.totalorder %s3203_s0, 0 }
  0xb0   : > { %s2494_s2 = smov [#allocation12]   ;;  %s2495_s17 = smov [#allocation15]  }
  0xb1   : > { %1975 = dma.hbm_to_smem (!%p3223_p7), %s3221_s7, 16, %s2493_s21, [#allocation5]  }
  0xb2   : > { %s458_s15 = sshll.u32 %s2494_s2, 4  ;;  %s490_s19 = sshll.u32 %s2495_s17, 4  ;;  %s459_s15 = int_to_ptr.vmem [resolvable:$true] %s458_s15  ;;  %s2820_s19 = int_to_ptr.vmem [resolvable:$true] %s490_s19 }
  0xb3   : > { %s3224_s6 = sld [smem:[#allocation38_spill]] }
  0xb9   : > { %s2255_s24 = scalar_lea.hbm %s3224_s6, 1024 }
  0xba   : > { %p2256_p12 = scmp.ne.s32.totalorder %s3224_s6, %s2255_s24  ;;  %p2262_p9 = scmp.lt.u32.totalorder %s2255_s24, %s3224_s6 }
  0xbc   : > { %p2258_p13 = pnand %p2256_p12, %p3222_p3 }
  0xbe   : > { %p2259_p5 = pneg %p2258_p13 }
  0xc0   : > { %p2264_p11 = pnand %p2262_p9, %p2259_p5 }
  0xc2   : > { %2267 = shalt.err (!%p2264_p11)
}
  0xc3   : > { %s2268_s13 = scalar_lea.vmem %s459_s15, 1024  ;;  %p2276_p4 = scmp.lt.s32.totalorder %s459_s15, %s459_s15 }
  0xc4   : > { %p2269_p1 = scmp.ne.s32.totalorder %s459_s15, %s2268_s13  ;;  %p2277_p10 = scmp.lt.s32.totalorder %s2268_s13, %s2268_s13 }
  0xc6   : > { %p2271_p6 = pnand %p2269_p1, %p3222_p3  ;;  %p2278_p0 = por %p2277_p10, %p2276_p4 }
  0xc8   : > { %p2272_p8 = pneg %p2271_p6 }
  0xca   : > { %p2279_p2 = pnand %p2278_p0, %p2272_p8 }
  0xcc   : > { %2282 = shalt.err (!%p2279_p2)
}
  0xcd   : > { %1981 = dma.hbm_to_vmem [thread:$0]  (!%p3223_p7), %s3224_s6, 1024, %s459_s15, [#allocation11], %s3220_s20, %s3220_s20, %s3219_s8  }
  0xce   : > { %s2283_s11 = scalar_lea.hbm %s3152_s10, 1024 }
  0xcf   : > { %p2284_p12 = scmp.ne.s32.totalorder %s3152_s10, %s2283_s11  ;;  %p2290_p13 = scmp.lt.u32.totalorder %s2283_s11, %s3152_s10 }
  0xd1   : > { %p2286_p0 = pnand %p2284_p12, %p3222_p3 }
  0xd3   : > { %p2287_p2 = pneg %p2286_p0 }
  0xd5   : > { %p2292_p5 = pnand %p2290_p13, %p2287_p2 }
  0xd7   : > { %2295 = shalt.err (!%p2292_p5)
}
  0xd8   : > { %s2296_s15 = scalar_lea.vmem %s2820_s19, 1024  ;;  %p2304_p6 = scmp.lt.s32.totalorder %s2820_s19, %s2820_s19 }
  0xd9   : > { %p2297_p9 = scmp.ne.s32.totalorder %s2820_s19, %s2296_s15  ;;  %p2305_p8 = scmp.lt.s32.totalorder %s2296_s15, %s2296_s15 }
  0xdb   : > { %p2299_p11 = pnand %p2297_p9, %p3222_p3  ;;  %p2306_p4 = por %p2305_p8, %p2304_p6 }
  0xdd   : > { %p2300_p1 = pneg %p2299_p11 }
  0xdf   : > { %p2307_p10 = pnand %p2306_p4, %p2300_p1 }
  0xe1   : > { %2310 = shalt.err (!%p2307_p10)
}
  0xe2   : > { %1987 = dma.hbm_to_vmem [thread:$0]  (!%p3223_p7), %s3152_s10, 1024, %s2820_s19, [#allocation14], %s3220_s20, %s3220_s20, %s3219_s8  }
  0xe3   : > { %s2496_s25 = smov [#allocation18]   ;;  %s2873_s24 = scalar_lea.hbm %s3143_s1, %s2755_s26 }
  0xe4   : > { %s522_s2 = sshll.u32 %s2496_s25, 4  ;;  %s2311_s21 = scalar_lea.hbm %s3156_s14, 1024  ;;  %s523_s2 = int_to_ptr.vmem [resolvable:$true] %s522_s2 }
  0xe5   : > { %p2312_p12 = scmp.ne.s32.totalorder %s3156_s14, %s2311_s21  ;;  %p2318_p13 = scmp.lt.u32.totalorder %s2311_s21, %s3156_s14 }
  0xe7   : > { %p2314_p0 = pnand %p2312_p12, %p3222_p3 }
  0xe9   : > { %p2315_p2 = pneg %p2314_p0 }
  0xeb   : > { %p2320_p5 = pnand %p2318_p13, %p2315_p2 }
  0xed   : > { %2323 = shalt.err (!%p2320_p5)
}
  0xee   : > { %s2324_s18 = scalar_lea.vmem %s523_s2, 1024  ;;  %p2332_p6 = scmp.lt.s32.totalorder %s523_s2, %s523_s2 }
  0xef   : > { %p2325_p9 = scmp.ne.s32.totalorder %s523_s2, %s2324_s18  ;;  %p2333_p8 = scmp.lt.s32.totalorder %s2324_s18, %s2324_s18 }
  0xf1   : > { %p2327_p11 = pnand %p2325_p9, %p3222_p3  ;;  %p2334_p4 = por %p2333_p8, %p2332_p6 }
  0xf3   : > { %p2328_p1 = pneg %p2327_p11 }
  0xf5   : > { %p2335_p10 = pnand %p2334_p4, %p2328_p1 }
  0xf7   : > { %2338 = shalt.err (!%p2335_p10)
}
  0xf8   : > { %1993 = dma.hbm_to_vmem [thread:$0]  (!%p3223_p7), %s3156_s14, 1024, %s523_s2, [#allocation17], %s3220_s20, %s3220_s20, %s3219_s8  }
  0xf9   : > { %s543_s29 = scalar_lea.vmem [#allocation6], %s2752_s30  ;;  %s2903_s9 = scalar_lea.hbm %s3145_s3, %s2755_s26 }
  0xfa   : > { %s550_s17 = sshll.u32 %s543_s29, 4  ;;  %s3225_s16 = sand.u32 1, %s2481_s23   ;;  %s2897_s17 = int_to_ptr.vmem [resolvable:$true] %s550_s17 }
  0xfb   : > { %s2907_s21 = scalar_lea.sflag [#allocation3], %s3225_s16  ;;  %s2339_s15 = scalar_lea.hbm %s2873_s24, 128 }
  0xfc   : > { %p2340_p3 = scmp.ne.s32.totalorder %s2873_s24, %s2339_s15  ;;  %p3226_p12 = scmp.ne.s32.totalorder %s3218_s12, 0 }
  0xfd   : > { %s2344_s2 = scalar_lea.hbm %s3143_s1, 256  ;;  %p2345_p7 = scmp.lt.u32.totalorder %s2873_s24, %s3143_s1 }
  0xfe   : > { %p2342_p0 = pnand %p2340_p3, %p3226_p12  ;;  %p2346_p13 = scmp.lt.u32.totalorder %s2344_s2, %s2339_s15 }
  0xff   : > { %p2348_p9 = scmp.lt.u32.totalorder %s2339_s15, %s2873_s24 }
 0x100   : > { %p2343_p2 = pneg %p2342_p0  ;;  %p2347_p5 = por %p2346_p13, %p2345_p7 }
 0x102   : > { %p2349_p11 = por %p2348_p9, %p2347_p5 }
 0x104   : > { %p2350_p1 = pnand %p2349_p11, %p2343_p2 }
 0x106   : > { %2353 = shalt.err (!%p2350_p1)
}
 0x107   : > { %s2354_s26 = scalar_lea.vmem %s2897_s17, 128  ;;  %s2497_s25 = smov [#allocation6]  }
 0x108   : > { %p2355_p6 = scmp.ne.s32.totalorder %s2897_s17, %s2354_s26  ;;  %s2359_s29 = sshll.u32 %s2497_s25, 4  ;;  %s2360_s29 = int_to_ptr.vmem [resolvable:$false] %s2359_s29 }
 0x109   : > { %s2361_s0 = scalar_lea.vmem %s2360_s29, 256  ;;  %p2362_p10 = scmp.lt.s32.totalorder %s2897_s17, %s2360_s29 }
 0x10a   : > { %p2357_p8 = pnand %p2355_p6, %p3226_p12  ;;  %p2363_p3 = scmp.lt.s32.totalorder %s2361_s0, %s2354_s26 }
 0x10c   : > { %p2358_p4 = pneg %p2357_p8  ;;  %p2364_p0 = por %p2363_p3, %p2362_p10 }
 0x10e   : > { %p2365_p7 = pnand %p2364_p0, %p2358_p4 }
 0x110   : > { %2368 = shalt.err (!%p2365_p7)
}
 0x111   : > { %p3227_p2 = scmp.ne.s32.totalorder %s3216_s5, 0  ;;  %s585_s11 = scalar_lea.vmem [#allocation9], %s2752_s30 }
 0x112   : > { %s592_s16 = sshll.u32 %s585_s11, 4  ;;  %s2369_s15 = scalar_lea.hbm %s2903_s9, 128  ;;  %s2935_s16 = int_to_ptr.vmem [resolvable:$true] %s592_s16 }
 0x113   : > { %1997 = dma.hbm_to_vmem [thread:$0]  (!%p3227_p2), %s2873_s24, 128, %s2897_s17, %s2907_s21, %s3220_s20, %s3220_s20, %s3219_s8  }
 0x114   : > { %p2370_p13 = scmp.ne.s32.totalorder %s2903_s9, %s2369_s15  ;;  %s2374_s2 = scalar_lea.hbm %s3145_s3, 256 }
 0x115   : > { %p2375_p11 = scmp.lt.u32.totalorder %s2903_s9, %s3145_s3  ;;  %p2376_p1 = scmp.lt.u32.totalorder %s2374_s2, %s2369_s15 }
 0x116   : > { %p2372_p5 = pnand %p2370_p13, %p3226_p12  ;;  %p2378_p8 = scmp.lt.u32.totalorder %s2369_s15, %s2903_s9 }
 0x117   : > { %p2377_p6 = por %p2376_p1, %p2375_p11 }
 0x118   : > { %p2373_p9 = pneg %p2372_p5 }
 0x119   : > { %p2379_p4 = por %p2378_p8, %p2377_p6 }
 0x11b   : > { %p2380_p10 = pnand %p2379_p4, %p2373_p9 }
 0x11d   : > { %2383 = shalt.err (!%p2380_p10)
}
 0x11e   : > { %s2384_s30 = scalar_lea.vmem %s2935_s16, 128  ;;  %s2498_s24 = smov [#allocation9]  }
 0x11f   : > { %p2385_p3 = scmp.ne.s32.totalorder %s2935_s16, %s2384_s30  ;;  %s2389_s17 = sshll.u32 %s2498_s24, 4  ;;  %s2390_s17 = int_to_ptr.vmem [resolvable:$false] %s2389_s17 }
 0x120   : > { %s2391_s21 = scalar_lea.vmem %s2390_s17, 256  ;;  %p2392_p13 = scmp.lt.s32.totalorder %s2935_s16, %s2390_s17 }
 0x121   : > { %p2387_p0 = pnand %p2385_p3, %p3226_p12  ;;  %p2393_p5 = scmp.lt.s32.totalorder %s2391_s21, %s2384_s30 }
 0x123   : > { %p2388_p7 = pneg %p2387_p0  ;;  %p2394_p11 = por %p2393_p5, %p2392_p13 }
 0x125   : > { %p2395_p1 = pnand %p2394_p11, %p2388_p7 }
 0x127   : > { %2398 = shalt.err (!%p2395_p1)
}
 0x128   : > { %2003 = dma.hbm_to_vmem [thread:$0]  (!%p3227_p2), %s2903_s9, 128, %s2935_s16, %s2771_s4, %s3220_s20, %s3220_s20, %s3219_s8  }
 0x129   : > { %p3228_p12 = scmp.ne.s32.totalorder %s3202_s28, 0 }
 0x12a   : > { %p3229_p9 = scmp.eq.s32.totalorder (!%p3228_p12), %s2610_s27, 0 }
 0x12b   : > { %604 = sbr.rel (%p3228_p12) target bundleno = 1319 (0x527), region = 84 }
 0x132   : > { %2444 = dma.done.wait (%p3229_p9), [#allocation5], 16   ;;  %p3230_p6 = pmov %p3229_p9 }
 0x133   : > { %s3231_s12 = sld [smem:[#allocation31_spill]]  ;;  %s2969_s26 = sand.u32 1, %s2477_s22  }
 0x134   : > { %2446 = vsyncadd (%p3230_p6), [#allocation5], 4294967280  ;;  %s2972_s5 = sshll.u32 %s2969_s26, 3  ;;  %s611_s25 = scalar_lea.sflag [#allocation3], %s2969_s26 }
 0x135   : > { %s614_s4 = scalar_lea.vmem [#allocation6], %s2972_s5 }
 0x139   : > { %p3232_p2 = scmp.ne.s32.totalorder %s3231_s12, 0 }
 0x13b   : > { %2448 = dma.done.wait (%p3232_p2), %s611_s25, 128  }
 0x13c   : > { %2450 = vsyncadd (%p3232_p2), %s611_s25, 4294967168  ;;  %s619_s28 = sand.u32 1, %s2610_s27   ;;  %s623_s20 = scalar_lea.vmem [#allocation7], %s2972_s5 }
 0x13d   : > { %s620_s8 = scalar_lea.sflag [#allocation8], %s619_s28 }
 0x13e   : > { %2452 = dma.done.wait (%p3232_p2), %s620_s8, 256  }
 0x13f   : > { %2454 = vsyncadd (%p3232_p2), %s620_s8, 4294967040  ;;  %s632_s9 = scalar_lea.vmem [#allocation9], %s2972_s5  ;;  %p3233_p8 = pmov %p3230_p6 }
 0x140   : > { %p3234_p4 = pmov %p3230_p6 }
 0x141   : > { %2456 = dma.done.wait (%p3233_p8), [#allocation11], 2048  }
 0x142   : > { %2458 = vsyncadd (%p3234_p4), [#allocation11], 4294965248  ;;  %p3235_p10 = pmov %p3234_p4 }
 0x143   : > { %p3236_p3 = pmov %p3234_p4 }
 0x144   : > { %2460 = dma.done.wait (%p3235_p10), [#allocation14], 2048  }
 0x145   : > { %2462 = vsyncadd (%p3236_p3), [#allocation14], 4294965248  ;;  %p3237_p0 = pmov %p3236_p3 }
 0x147   : > { %2464 = dma.done.wait (%p3237_p0), [#allocation17], 2048   ;;  %p3238_p7 = pmov %p3237_p0 }
 0x149   : > { %2466 = vsyncadd (%p3238_p7), [#allocation17], 4294965248 }
 0x14a   : > { %661 = sfence }
 0x14b   : > { %v2069_v0 = vld [vmem:[#allocation10] sm:$0xff]   ;;  %v2499_v1 = vmov 0.0   ;;  %v2071_v3 = vld [vmem:[#allocation10 + $0x8] sm:$0xff]   ;;  %vm2500_vm0 = vmmov 0   ;;  %v2073_v5 = vld [vmem:[#allocation10 + $0x10] sm:$0xff]   ;;  %s1087_s29 = sld [smem:[#allocation2]] }
 0x14c   : > { %1816 = vmatprep.subr.bf16.mxu0 %v2499_v1  ;;  %1836 = vmatprep.subr.bf16.mxu1 %v2499_v1  ;;  %v2070_v2 = vld [vmem:[#allocation12] sm:$0xff]   ;;  %v2072_v4 = vld [vmem:[#allocation12 + $0x8] sm:$0xff]   ;;  %v2074_v6 = vld [vmem:[#allocation12 + $0x10] sm:$0xff]   ;;  %s1722_s0 = sld [smem:[#allocation2 + $0x1]]  ;;  %s3239_s15 = sld [smem:[#allocation37_spill]] }
 0x14d   : > { %1817 = vmatpush3.bf16.msra.mxu0 %v2069_v0  ;;  %1832 = vmatprep.mubr.msk.bf16.mxu0 %vm2500_vm0, %v2499_v1  ;;  %v2075_v7 = vld [vmem:[#allocation10 + $0x18] sm:$0xff]   ;;  %v2077_v9 = vld [vmem:[#allocation10 + $0x20] sm:$0xff]   ;;  %v2079_v11 = vld [vmem:[#allocation10 + $0x28] sm:$0xff]   ;;  %s3240_s2 = sld [smem:[#allocation39_spill]]  ;;  %s1723_s18 = sld [smem:[#allocation2 + $0x2]] }
 0x14e   : > { %1837 = vmatpush3.bf16.msra.mxu1 %v2070_v2  ;;  %1818 = vmatprep.subr.bf16.mxu0 %v2499_v1  ;;  %v2076_v8 = vld [vmem:[#allocation12 + $0x18] sm:$0xff]   ;;  %v2078_v10 = vld [vmem:[#allocation12 + $0x20] sm:$0xff]   ;;  %v2080_v12 = vld [vmem:[#allocation12 + $0x28] sm:$0xff]   ;;  %s3241_s24 = sld [smem:[#allocation41_spill]]  ;;  %s3242_s12 = sld [smem:[#allocation42_spill]] }
 0x14f   : > { %1838 = vmatprep.subr.bf16.mxu1 %v2499_v1  ;;  %1852 = vmatprep.mubr.msk.bf16.mxu1 %vm2500_vm0, %v2499_v1  ;;  %v2081_v13 = vld [vmem:[#allocation10 + $0x30] sm:$0xff]   ;;  %v2083_v15 = vld [vmem:[#allocation10 + $0x38] sm:$0xff]   ;;  %v2086_v18 = vld [vmem:[%s623_s20] sm:$0xff]   ;;  %s1691_s28 = sshll.u32 %s2969_s26, 4  ;;  %s1761_s16 = sshll.u32 %s2610_s27, 8 }
 0x150   : > { %v2082_v14 = vld [vmem:[#allocation12 + $0x30] sm:$0xff]   ;;  %v2084_v16 = vld [vmem:[#allocation12 + $0x38] sm:$0xff]   ;;  %v2087_v19 = vld [vmem:[#allocation13] sm:$0xff]   ;;  %s3246_s13 = sld [smem:[#allocation46_spill]]  ;;  %s2501_s6 = smov [#allocation19]  }
 0x151   : > { %1819 = vmatpush3.bf16.msra.mxu0 %v2071_v3  ;;  %v2085_v17 = vld [vmem:[%s614_s4] sm:$0xff]   ;;  %v2088_v20 = vld [vmem:[#allocation13 + $0x8] sm:$0xff]   ;;  %v2091_v23 = vld [vmem:[#allocation13 + $0x20] sm:$0xff]   ;;  %v1090_v48 = vstv %s1087_s29  ;;  %s3243_s4 = sld [smem:[#allocation44_spill]]  ;;  %s715_s29 = scalar_lea.vmem [#allocation19], %s1691_s28 }
 0x152   : > { %1839 = vmatpush3.bf16.msra.mxu1 %v2072_v4  ;;  %1820 = vmatprep.subr.bf16.mxu0 %v2499_v1  ;;  %v2089_v21 = vld [vmem:[#allocation13 + $0x10] sm:$0xff]   ;;  %v2090_v22 = vld [vmem:[#allocation13 + $0x18] sm:$0xff]   ;;  %v2092_v24 = vld [vmem:[#allocation13 + $0x28] sm:$0xff]   ;;  %v1093_v53 = vstv %s1722_s0  ;;  %s3245_s0 = sld [smem:[#allocation32_spill]]  ;;  %s1476_s11 = sshll.u32 %s715_s29, 4  ;;  %s3093_s11 = int_to_ptr.vmem [resolvable:$true] %s1476_s11 }
 0x153   : > { %1840 = vmatprep.subr.bf16.mxu1 %v2499_v1  ;;  %v2093_v25 = vld [vmem:[#allocation13 + $0x30] sm:$0xff]   ;;  %v2094_v26 = vld [vmem:[#allocation13 + $0x38] sm:$0xff]   ;;  %v2096_v28 = vld [vmem:[#allocation15] sm:$0xff]   ;;  %s2399_s27 = scalar_lea.vmem %s3093_s11, 256  ;;  %s2403_s30 = sshll.u32 %s2501_s6, 4  ;;  %s2404_s30 = int_to_ptr.vmem [resolvable:$false] %s2403_s30 }
 0x154   : > { %v2095_v27 = vld [vmem:[%s632_s9] sm:$0xff]   ;;  %v2097_v29 = vld [vmem:[#allocation15 + $0x8] sm:$0xff]   ;;  %v2100_v32 = vld [vmem:[#allocation15 + $0x20] sm:$0xff]   ;;  %s3244_s9 = sld [smem:[#allocation45_spill]]  ;;  %p2400_p13 = scmp.ne.s32.totalorder %s3093_s11, %s2399_s27 }
 0x155   : > { %1821 = vmatpush3.bf16.msra.mxu0 %v2073_v5  ;;  %v2098_v30 = vld [vmem:[#allocation15 + $0x10] sm:$0xff]   ;;  %v2099_v31 = vld [vmem:[#allocation15 + $0x18] sm:$0xff]   ;;  %v2101_v33 = vld [vmem:[#allocation15 + $0x28] sm:$0xff]   ;;  %p2406_p12 = scmp.lt.s32.totalorder %s3093_s11, %s2404_s30 }
 0x156   : > { %1841 = vmatpush3.bf16.msra.mxu1 %v2074_v6  ;;  %1822 = vmatprep.subr.bf16.mxu0 %v2499_v1  ;;  %v2102_v34 = vld [vmem:[#allocation15 + $0x30] sm:$0xff]   ;;  %v2103_v35 = vld [vmem:[#allocation15 + $0x38] sm:$0xff]   ;;  %v2104_v36 = vld [vmem:[#allocation16] sm:$0xff]  }
 0x157   : > { %1842 = vmatprep.subr.bf16.mxu1 %v2499_v1  ;;  %v2105_v37 = vld [vmem:[#allocation16 + $0x8] sm:$0xff]   ;;  %v2106_v38 = vld [vmem:[#allocation16 + $0x10] sm:$0xff]   ;;  %v2107_v39 = vld [vmem:[#allocation16 + $0x18] sm:$0xff]  }
 0x158   : > { %v2108_v40 = vld [vmem:[#allocation16 + $0x20] sm:$0xff]   ;;  %v2109_v41 = vld [vmem:[#allocation16 + $0x28] sm:$0xff]   ;;  %v1692_v42 = vld [vmem:[%s3239_s15] ss:$0 sm:$0xff]  ;;  %p3247_p5 = scmp.ne.s32.totalorder %s3245_s0, 0 }
 0x159   : > { %1823 = vmatpush3.bf16.msra.mxu0 %v2075_v7  ;;  %v1702_v43 = vld [vmem:[%s3240_s2] ss:$0 sm:$0xff]  ;;  %s3098_s2 = scalar_lea.hbm %s3246_s13, %s1761_s16 }
 0x15a   : > { %1843 = vmatpush3.bf16.msra.mxu1 %v2076_v8  ;;  %1824 = vmatprep.subr.bf16.mxu0 %v2499_v1  ;;  %v1712_v5 = vld [vmem:[%s3241_s24] ss:$0 sm:$0xff]  ;;  %p2401_p11 = pnand %p2400_p13, %p3247_p5  ;;  %s2405_s24 = scalar_lea.vmem %s2404_s30, 512 }
 0x15b   : > { %1844 = vmatprep.subr.bf16.mxu1 %v2499_v1  ;;  %p2407_p9 = scmp.lt.s32.totalorder %s2405_s24, %s2399_s27 }
 0x15c   : > { %p2402_p1 = pneg %p2401_p11 }
 0x15d   : > { %1825 = vmatpush3.bf16.msra.mxu0 %v2077_v9  ;;  %v1098_v9 = vstv %s1723_s18  ;;  %s1463_s18 = scalar_lea.sflag [#allocation4], %s2969_s26  ;;  %p2408_p6 = por %p2407_p9, %p2406_p12 }
 0x15e   : > { %1845 = vmatpush3.bf16.msra.mxu1 %v2078_v10  ;;  %1826 = vmatprep.subr.bf16.mxu0 %v2499_v1 }
 0x15f   : > { %1846 = vmatprep.subr.bf16.mxu1 %v2499_v1  ;;  %p2409_p2 = pnand %p2408_p6, %p2402_p1 }
 0x161   : > { %1827 = vmatpush3.bf16.msra.mxu0 %v2079_v11 }
 0x162   : > { %1847 = vmatpush3.bf16.msra.mxu1 %v2080_v12  ;;  %1828 = vmatprep.subr.bf16.mxu0 %v2499_v1 }
 0x163   : > { %1848 = vmatprep.subr.bf16.mxu1 %v2499_v1 }
 0x165   : > { %1829 = vmatpush3.bf16.msra.mxu0 %v2081_v13 }
 0x166   : > { %1849 = vmatpush3.bf16.msra.mxu1 %v2082_v14  ;;  %1830 = vmatprep.subr.bf16.mxu0 %v2499_v1 }
 0x167   : > { %1850 = vmatprep.subr.bf16.mxu1 %v2499_v1 }
 0x169   : > { %1831 = vmatpush3.bf16.msra.mxu0 %v2083_v15 }
 0x16a   : > { %1851 = vmatpush3.bf16.msra.mxu1 %v2084_v16  ;;  %1856 = vmatprep.subr.bf16.mxu0 %v2499_v1 }
 0x16b   : > { %1876 = vmatprep.subr.bf16.mxu1 %v2499_v1 }
 0x16c   : > { %1833 = vmatmul.mubr.bf16.vlgmr.msra.gmra.mrb[0].mxu0 %v2085_v17 }
 0x16d   : > { %1853 = vmatmul.mubr.bf16.vlgmr.msra.gmra.mrb[0].mxu1 %v2086_v18  ;;  %1857 = vmatpush3.bf16.msra.mxu0 %v2087_v19 }
 0x16e   : > { %1858 = vmatprep.subr.bf16.mxu0 %v2499_v1  ;;  %1872 = vmatprep.mubr.msk.bf16.mxu0 %vm2500_vm0, %v2499_v1 }
 0x16f   : > { %1892 = vmatprep.mubr.msk.bf16.mxu1 %vm2500_vm0, %v2499_v1  ;;  %1877 = vmatpush3.bf16.msra.mxu1 %v2096_v28 }
 0x170   : > { %1878 = vmatprep.subr.bf16.mxu1 %v2499_v1 }
 0x171   : > { %1859 = vmatpush3.bf16.msra.mxu0 %v2088_v20  ;;  %v2110_v20 = vld [vmem:[#allocation16 + $0x30] sm:$0xff]  }
 0x172   : > { %1860 = vmatprep.subr.bf16.mxu0 %v2499_v1 }
 0x173   : > { %1879 = vmatpush3.bf16.msra.mxu1 %v2097_v29 }
 0x174   : > { %1880 = vmatprep.subr.bf16.mxu1 %v2499_v1 }
 0x175   : > { %1861 = vmatpush3.bf16.msra.mxu0 %v2089_v21  ;;  %v2111_v21 = vld [vmem:[#allocation16 + $0x38] sm:$0xff]  }
 0x176   : > { %1862 = vmatprep.subr.bf16.mxu0 %v2499_v1 }
 0x177   : > { %1881 = vmatpush3.bf16.msra.mxu1 %v2098_v30 }
 0x178   : > { %1882 = vmatprep.subr.bf16.mxu1 %v2499_v1 }
 0x179   : > { %1863 = vmatpush3.bf16.msra.mxu0 %v2090_v22  ;;  %v1724_v22 = vld [vmem:[%s3242_s12] ss:$0 sm:$0xff] }
 0x17a   : > { %1864 = vmatprep.subr.bf16.mxu0 %v2499_v1 }
 0x17b   : > { %1883 = vmatpush3.bf16.msra.mxu1 %v2099_v31 }
 0x17c   : > { %1884 = vmatprep.subr.bf16.mxu1 %v2499_v1 }
 0x17d   : > { %1865 = vmatpush3.bf16.msra.mxu0 %v2091_v23 }
 0x17e   : > { %1866 = vmatprep.subr.bf16.mxu0 %v2499_v1 }
 0x17f   : > { %1885 = vmatpush3.bf16.msra.mxu1 %v2100_v32  ;;  %v2112_v32 = vld [vmem:[#allocation18] sm:$0xff]  }
 0x180   : > { %1886 = vmatprep.subr.bf16.mxu1 %v2499_v1 }
 0x181   : > { %1867 = vmatpush3.bf16.msra.mxu0 %v2092_v24 }
 0x182   : > { %1868 = vmatprep.subr.bf16.mxu0 %v2499_v1 }
 0x183   : > { %1887 = vmatpush3.bf16.msra.mxu1 %v2101_v33  ;;  %v2113_v33 = vld [vmem:[#allocation18 + $0x8] sm:$0xff]  }
 0x184   : > { %1888 = vmatprep.subr.bf16.mxu1 %v2499_v1 }
 0x185   : > { %1869 = vmatpush3.bf16.msra.mxu0 %v2093_v25 }
 0x186   : > { %1870 = vmatprep.subr.bf16.mxu0 %v2499_v1 }
 0x187   : > { %1889 = vmatpush3.bf16.msra.mxu1 %v2102_v34  ;;  %v2114_v34 = vld [vmem:[#allocation18 + $0x10] sm:$0xff]  }
 0x188   : > { %1890 = vmatprep.subr.bf16.mxu1 %v2499_v1 }
 0x189   : > { %1871 = vmatpush3.bf16.msra.mxu0 %v2094_v26 }
 0x18a   : > { %1896 = vmatprep.subr.bf16.mxu0 %v2499_v1 }
 0x18b   : > { %1891 = vmatpush3.bf16.msra.mxu1 %v2103_v35  ;;  %v2115_v35 = vld [vmem:[#allocation18 + $0x18] sm:$0xff]  }
 0x18c   : > { %1873 = vmatmul.mubr.bf16.vlgmr.msra.gmra.mrb[4].mxu0 %v2095_v27  ;;  %1916 = vmatprep.subr.bf16.mxu1 %v2499_v1 }
 0x18d   : > { %1912 = vmatprep.mubr.msk.bf16.mxu0 %vm2500_vm0, %v2499_v1  ;;  %1897 = vmatpush3.bf16.msra.mxu0 %v2104_v36  ;;  %v2116_v36 = vld [vmem:[#allocation18 + $0x20] sm:$0xff]  }
 0x18e   : > { %1898 = vmatprep.subr.bf16.mxu0 %v2499_v1 }
 0x191   : > { %1899 = vmatpush3.bf16.msra.mxu0 %v2105_v37  ;;  %v2117_v37 = vld [vmem:[#allocation18 + $0x28] sm:$0xff]  }
 0x192   : > { %1900 = vmatprep.subr.bf16.mxu0 %v2499_v1 }
 0x195   : > { %1901 = vmatpush3.bf16.msra.mxu0 %v2106_v38  ;;  %v2118_v38 = vld [vmem:[#allocation18 + $0x30] sm:$0xff]  }
 0x196   : > { %1902 = vmatprep.subr.bf16.mxu0 %v2499_v1 }
 0x199   : > { %1903 = vmatpush3.bf16.msra.mxu0 %v2107_v39  ;;  %v2119_v39 = vld [vmem:[#allocation18 + $0x38] sm:$0xff]  }
 0x19a   : > { %1904 = vmatprep.subr.bf16.mxu0 %v2499_v1 }
 0x19d   : > { %1905 = vmatpush3.bf16.msra.mxu0 %v2108_v40  ;;  %v1733_v40 = vld [vmem:[%s3243_s4] ss:$0 sm:$0xff] }
 0x19e   : > { %1906 = vmatprep.subr.bf16.mxu0 %v2499_v1 }
 0x1a1   : > { %1907 = vmatpush3.bf16.msra.mxu0 %v2109_v41 }
 0x1a2   : > { %1908 = vmatprep.subr.bf16.mxu0 %v2499_v1 }
 0x1a5   : > { %1909 = vmatpush3.bf16.msra.mxu0 %v2110_v20 }
 0x1a6   : > { %1910 = vmatprep.subr.bf16.mxu0 %v2499_v1 }
 0x1a9   : > { %1911 = vmatpush3.bf16.msra.mxu0 %v2111_v21 }
 0x23f   : > { %v834_v44 = vpop.f32.mrb[0].mxu0 }
 0x240   : > { %v835_v45 = vadd.f32 %v1692_v42, %v834_v44  ;;  %v956_v46 = vpop.f32.mrb[0].mxu1  ;;  %v1834_v47 = vpop.f32.mrb[1].mxu0 }
 0x241   : > { %v957_v49 = vadd.f32 %v1702_v43, %v956_v46  ;;  %v1854_v50 = vpop.f32.mrb[1].mxu1  ;;  %v837_v51 = vpop.f32.mrb[2].mxu0 }
 0x242   : > { %v841_v52 = vmax.f32 %v835_v45, 0.0  ;;  %v838_v54 = vadd.f32 %v1692_v42, %v837_v51  ;;  %v959_v55 = vpop.f32.mrb[2].mxu1  ;;  %v1835_v56 = vpop.f32.mrb[3].mxu0 }
 0x243   : > { %v963_v57 = vmax.f32 %v957_v49, 0.0  ;;  %v960_v58 = vadd.f32 %v1702_v43, %v959_v55  ;;  %v1855_v59 = vpop.f32.mrb[3].mxu1 }
 0x244   : > { %v1091_v60 = vmul.f32 %v1090_v48, %v841_v52  ;;  %v842_v61 = vmax.f32 %v838_v54, 0.0  ;;  %v1744_v59 = vld [vmem:[%s3244_s9] ss:$0 sm:$0xff] }
 0x245   : > { %v1094_v62 = vmul.f32 %v1093_v53, %v963_v57  ;;  %v964_v63 = vmax.f32 %v960_v58, 0.0 }
 0x246   : > { %v1092_v0 = vmul.f32 %v1090_v48, %v842_v61 }
 0x247   : > { %v1096_v2 = vadd.f32 %v1094_v62, %v1091_v60  ;;  %v1095_v3 = vmul.f32 %v1093_v53, %v964_v63 }
 0x249   : > { %v1097_v4 = vadd.f32 %v1095_v3, %v1092_v0 }
 0x25f   : > { %v1078_v6 = vpop.f32.mrb[4].mxu0 }
 0x260   : > { %v1079_v7 = vadd.f32 %v1712_v5, %v1078_v6  ;;  %v1874_v8 = vpop.f32.mrb[5].mxu0 }
 0x261   : > { %v1081_v10 = vpop.f32.mrb[6].mxu0 }
 0x262   : > { %v1085_v11 = vmax.f32 %v1079_v7, 0.0  ;;  %v1082_v12 = vadd.f32 %v1712_v5, %v1081_v10  ;;  %v1875_v13 = vpop.f32.mrb[7].mxu0 }
 0x264   : > { %v1099_v14 = vmul.f32 %v1098_v9, %v1085_v11  ;;  %v1086_v15 = vmax.f32 %v1082_v12, 0.0 }
 0x266   : > { %v3064_v16 = vadd.f32 %v1099_v14, %v1096_v2  ;;  %v1100_v17 = vmul.f32 %v1098_v9, %v1086_v15 }
 0x268   : > { %v3066_v18 = vadd.f32 %v1100_v17, %v1097_v4 }
 0x26a   : > { %v1103_v19 = vpack.c.bf16 %v3066_v18, %v3064_v16 }
 0x26c   : > { %1893 = vmatmul.mubr.bf16.vlgmr.msra.gmra.mrb[4].mxu1 %v1103_v19 }
 0x26d   : > { %1932 = vmatprep.mubr.msk.bf16.mxu1 %vm2500_vm0, %v2499_v1  ;;  %1917 = vmatpush3.bf16.msra.mxu1 %v2112_v32 }
 0x26e   : > { %1918 = vmatprep.subr.bf16.mxu1 %v2499_v1 }
 0x271   : > { %1919 = vmatpush3.bf16.msra.mxu1 %v2113_v33 }
 0x272   : > { %1920 = vmatprep.subr.bf16.mxu1 %v2499_v1 }
 0x275   : > { %1921 = vmatpush3.bf16.msra.mxu1 %v2114_v34 }
 0x276   : > { %1922 = vmatprep.subr.bf16.mxu1 %v2499_v1 }
 0x279   : > { %1923 = vmatpush3.bf16.msra.mxu1 %v2115_v35 }
 0x27a   : > { %1924 = vmatprep.subr.bf16.mxu1 %v2499_v1 }
 0x27d   : > { %1925 = vmatpush3.bf16.msra.mxu1 %v2116_v36 }
 0x27e   : > { %1926 = vmatprep.subr.bf16.mxu1 %v2499_v1 }
 0x281   : > { %1927 = vmatpush3.bf16.msra.mxu1 %v2117_v37 }
 0x282   : > { %1928 = vmatprep.subr.bf16.mxu1 %v2499_v1 }
 0x285   : > { %1929 = vmatpush3.bf16.msra.mxu1 %v2118_v38 }
 0x286   : > { %1930 = vmatprep.subr.bf16.mxu1 %v2499_v1 }
 0x289   : > { %1931 = vmatpush3.bf16.msra.mxu1 %v2119_v39 }
 0x33f   : > { %v1209_v23 = vpop.f32.mrb[4].mxu1 }
 0x340   : > { %v1210_v24 = vadd.f32 %v1724_v22, %v1209_v23  ;;  %v1894_v25 = vpop.f32.mrb[5].mxu1 }
 0x341   : > { %v1212_v26 = vpop.f32.mrb[6].mxu1 }
 0x342   : > { %v1213_v27 = vadd.f32 %v1724_v22, %v1212_v26  ;;  %v1895_v28 = vpop.f32.mrb[7].mxu1  ;;  %v1216_v29 = vmax.f32 %v1210_v24, 0.0 }
 0x344   : > { %v1217_v30 = vmax.f32 %v1213_v27, 0.0 }
 0x346   : > { %v1218_v31 = vpack.c.bf16 %v1217_v30, %v1216_v29 }
 0x348   : > { %1913 = vmatmul.mubr.bf16.vlgmr.msra.gmra.mrb[8].mxu0 %v1218_v31 }
 0x41b   : > { %v1324_v41 = vpop.f32.mrb[8].mxu0 }
 0x41c   : > { %v1325_v42 = vadd.f32 %v1733_v40, %v1324_v41  ;;  %v1914_v43 = vpop.f32.mrb[9].mxu0 }
 0x41d   : > { %v1327_v44 = vpop.f32.mrb[10].mxu0 }
 0x41e   : > { %v1742_v45 = vmul.f32 -1.442695, %v1325_v42  ;;  %v1328_v46 = vadd.f32 %v1733_v40, %v1327_v44  ;;  %v1915_v47 = vpop.f32.mrb[11].mxu0 }
 0x420   : > { %2120 = vpow2.f32 %v1742_v45  ;;  %v1743_v48 = vmul.f32 -1.442695, %v1328_v46 }
 0x422   : > { %2122 = vpow2.f32 %v1743_v48 }
 0x42a   : > { %v2121_v49 = vpop.eup %2120 }
 0x42b   : > { %v1337_v50 = vadd.f32 1.0, %v2121_v49 }
 0x42c   : > { %v2123_v51 = vpop.eup %2122 }
 0x42d   : > { %2124 = vrcp.f32 %v1337_v50  ;;  %v1338_v1 = vadd.f32 1.0, %v2123_v51 }
 0x42f   : > { %2126 = vrcp.f32 %v1338_v1 }
 0x437   : > { %v2125_v52 = vpop.eup %2124 }
 0x438   : > { %v1343_v53 = vmul.f32 %v2125_v52, %v3064_v16 }
 0x439   : > { %v2127_v54 = vpop.eup %2126 }
 0x43a   : > { %v1344_v55 = vmul.f32 %v2127_v54, %v3066_v18  ;;  %v1345_v56 = vmax.f32 %v1343_v53, 0.0 }
 0x43c   : > { %v1346_v57 = vmax.f32 %v1344_v55, 0.0 }
 0x43e   : > { %v1347_v58 = vpack.c.bf16 %v1346_v57, %v1345_v56 }
 0x440   : > { %1933 = vmatmul.mubr.bf16.vlgmr.msra.gmra.mrb[8].mxu1 %v1347_v58 }
 0x513   : > { %v1453_v60 = vpop.f32.mrb[8].mxu1 }
 0x514   : > { %v1454_v61 = vadd.f32 %v1744_v59, %v1453_v60  ;;  %v1934_v62 = vpop.f32.mrb[9].mxu1 }
 0x515   : > { %v1456_v63 = vpop.f32.mrb[10].mxu1 }
 0x516   : > { %1460 = vst [vmem:[%s715_s29] sm:$0xff] %v1454_v61  ;;  %v1457_v0 = vadd.f32 %v1744_v59, %v1456_v63  ;;  %v1935_v2 = vpop.f32.mrb[11].mxu1 }
 0x518   : > { %1461 = vst [vmem:[%s715_s29 + $0x8] sm:$0xff] %v1457_v0 }
 0x519   : > { %2412 = shalt.err (!%p2409_p2)
}
 0x51a   : > { %s2413_s17 = scalar_lea.hbm %s3098_s2, 256  ;;  %s2417_s5 = scalar_lea.hbm %s3246_s13, 512 }
 0x51b   : > { %p2414_p8 = scmp.ne.s32.totalorder %s3098_s2, %s2413_s17  ;;  %p2418_p3 = scmp.lt.u32.totalorder %s3098_s2, %s3246_s13 }
 0x51c   : > { %p2419_p0 = scmp.lt.u32.totalorder %s2417_s5, %s2413_s17  ;;  %p2421_p13 = scmp.lt.u32.totalorder %s2413_s17, %s3098_s2 }
 0x51d   : > { %p2415_p4 = pnand %p2414_p8, %p3247_p5 }
 0x51e   : > { %p2420_p7 = por %p2419_p0, %p2418_p3 }
 0x51f   : > { %p2416_p10 = pneg %p2415_p4 }
 0x520   : > { %p2422_p11 = por %p2421_p13, %p2420_p7 }
 0x522   : > { %p2423_p1 = pnand %p2422_p11, %p2416_p10 }
 0x524   : > { %2426 = shalt.err (!%p2423_p1)
}
 0x525   : > { %s2502_s28 = smov 128   ;;  %s2503_s8 = smov 8  }
 0x526   : > { %1970 = dma.vmem_to_hbm [thread:$0]  (%p3247_p5), %s3093_s11, 256, %s3098_s2, %s1463_s18, %s2502_s28, %s2502_s28, %s2503_s8  }
 0x527 PF: > { %s3248_s20 = sld [smem:[#allocation27_spill]]  ;;  %s3249_s9 = sld [smem:[#allocation33_spill]] }
 0x528   : > { %s3250_s29 = sld [smem:[#allocation28_spill]] }
 0x52d   : > { %s1491_s16 = sand.u32 1, %s3248_s20   ;;  %p3251_p12 = scmp.ne.s32.totalorder %s3249_s9, 0 }
 0x52e   : > { %p3252_p9 = scmp.ge.s32.totalorder %s3250_s29, 2  ;;  %s1492_s15 = scalar_lea.sflag [#allocation4], %s1491_s16 }
 0x530   : > { %p2005_p6 = pnand %p3252_p9, %p3251_p12 }
 0x532   : > { %2468 = dma.done.wait (!%p2005_p6), %s1492_s15, 256  }
 0x533   : > { %2470 = vsyncadd (!%p2005_p6), %s1492_s15, 4294967040  ;;  %s3253_s24 = sld [smem:[#allocation29_spill]]  ;;  %s3254_s19 = sld [smem:[#allocation30_spill]] }
 0x534   : > { %s3255_s21 = smov %s2477_s22  ;;  %s3256_s22 = smov %s2481_s23 }
 0x539   : > { %p36_p2 = scmp.ge.s32.totalorder %s3253_s24, 4   ;;  %s3257_s23 = smov %s3254_s19 }
 0x53b   :  { %38 = sbr.rel (!%p36_p2) target bundleno = 25 (0x19), region = 182 }
 0x542   :  { %1497 = vsyncpa [#allocation3], 1 }
 0x543   :  { %1499 = vsyncpa [#allocation3 + $0x1], 1 }
 0x544   :  { %1500 = vsyncpa [#allocation8], 1 }
 0x545   :  { %1502 = vsyncpa [#allocation8 + $0x1], 1 }
 0x546   :  { %1503 = vsyncpa [#allocation11], 1 }
 0x547   :  { %1504 = vsyncpa [#allocation14], 1 }
 0x548   :  { %1505 = vsyncpa [#allocation17], 1 }
 0x549   :  { %1506 = vsyncpa [#allocation4], 1 }
 0x54a   :  { %1508 = vsyncpa [#allocation4 + $0x1], 1 }
 0x54b   :  { %1509 = vsyncpa [#allocation5], 1 }
 0x54c   :  { %1511 = vsyncpa [#allocation5 + $0x1], 1 }

</bundles_post_ra>
